<compile_context>
chip_gen: v6e
topology: v6e:2x2x1
jax: 0.10.0
libtpu: 0.0.40
codegen_flags: <defaults>
</compile_context>

<pallas_src>
import math

import jax
import jax.numpy as jnp
from jax.experimental import pallas as pl
from jax.experimental.pallas import tpu as pltpu


def _round_up(x, m):
    return ((x + m - 1) // m) * m


# Min sublane multiple per element size (sub-32-bit dtypes pack along sublanes).
_SUBLANE = {4: 8, 2: 16, 1: 32}


def _detect_tpu():
    """Generation-aware limits (v5e/v6e: 128 MiB VMEM, v7x: 64 MiB/TC)."""
    try:
        vmem_cap = int(pltpu.get_tpu_info().vmem_capacity_bytes)
    except Exception:
        vmem_cap = 64 * 1024 * 1024                 # conservative (v7x-sized) fallback
    try:
        kind = jax.devices()[0].device_kind.lower()
    except Exception:
        kind = ""
    # v5e (and older) MXU is 128-wide; v6e/v7x are 256-wide.  512/256 tiles are
    # multiples of both, so this only matters for comments / future tuning.
    mxu = 128 if any(v in kind for v in ("v2", "v3", "v4", "v5")) else 256
    # Per-kernel scoped VMEM ceiling: half of physical, clamped to [32, 64] MiB.
    vmem_limit = max(32 * 1024 * 1024, min(vmem_cap // 2, 64 * 1024 * 1024))
    budget = (vmem_limit * 3) // 5                  # working-set target (headroom)
    return {"vmem_cap": vmem_cap, "mxu": mxu,
            "vmem_limit": vmem_limit, "budget": budget}


_TPU_CFG = _detect_tpu()


# ----------------------------------------------------------------------------
# Kernel 1: wrapped module forward  (y = x @ W_t + b), W_t = W.T cached padded.
# ----------------------------------------------------------------------------
def _linear_kernel_single_k(x_ref, wt_ref, b_ref, o_ref):
    # One MXU pass per (i, j) tile: no accumulator scratch, no pl.when branches.
    acc = jnp.dot(x_ref[...], wt_ref[...], preferred_element_type=jnp.float32)
    o_ref[...] = (acc + b_ref[...].astype(jnp.float32)).astype(o_ref.dtype)


def _linear_kernel_multi_k(x_ref, wt_ref, b_ref, o_ref, acc_ref):
    k = pl.program_id(2)

    @pl.when(k == 0)
    def _():
        acc_ref[...] = jnp.zeros_like(acc_ref)

    acc_ref[...] += jnp.dot(x_ref[...], wt_ref[...],
                            preferred_element_type=jnp.float32)

    @pl.when(k == pl.num_programs(2) - 1)
    def _():
        o_ref[...] = (acc_ref[...] + b_ref[...].astype(jnp.float32)).astype(o_ref.dtype)


def _linear_tiles(B, Kp, Np, itemsize, cfg):
    """Pick (tm, Mp, tk, tn, n_k).  Prefer a single K step (no accumulator
    revisits) and the largest lane-dense tiles that fit the VMEM budget."""
    sub = _SUBLANE.get(itemsize, 8)                 # dtype-aware sublane rounding
    tm = min(_round_up(B, sub), 256)
    Mp = _round_up(B, tm)
    budget = cfg["budget"]

    def footprint(tk, tn, n_k):
        in_b = 2 * (tm * tk + tk * tn) * itemsize            # double-buffered inputs
        out_b = 2 * tm * tn * itemsize + 2 * tn * itemsize   # output + bias
        acc_b = tm * tn * 4 if n_k > 1 else 0                # f32 accumulator scratch
        return in_b + out_b + acc_b

    # 512/256 tiles are multiples of both the 256-wide (v6e/v7x) and the
    # 128-wide (v5e) MXU; 128 is the floor.
    tn_cands = [t for t in (512, 256, 128) if Np % t == 0]
    best = None
    for tn in tn_cands:
        if footprint(Kp, tn, 1) <= budget:          # single-K fast path
            best = (tm, Mp, Kp, tn, 1)
            break
        for tk in (512, 256, 128):
            if Kp % tk == 0 and footprint(tk, tn, Kp // tk) <= budget:
                best = (tm, Mp, tk, tn, Kp // tk)
                break
        if best is not None:
            break
    if best is None:
        best = (tm, Mp, 128, 128, Kp // 128)

    # v7x megacore: if the whole grid would be a single tile, split N so both
    # TensorCores get work (only when N is big enough to split cleanly).
    tm_, Mp_, tk_, tn_, nk_ = best
    if Mp_ // tm_ == 1 and Np // tn_ == 1 and Np >= 256 and (Np // 2) % 128 == 0:
        best = (tm_, Mp_, tk_, Np // 2, nk_)
    return best


def _linear_forward_padded(x_p, wt_p, b_p, tm, tk, tn, n_k, cfg):
    Mp, Kp = x_p.shape
    Np = wt_p.shape[1]
    itemsize = jnp.dtype(x_p.dtype).itemsize
    cost = pl.CostEstimate(
        flops=2 * Mp * Kp * Np,
        transcendentals=0,
        bytes_accessed=(Mp * Kp + Kp * Np + Np + Mp * Np) * itemsize)

    if n_k == 1:
        return pl.pallas_call(
            _linear_kernel_single_k,
            out_shape=jax.ShapeDtypeStruct((Mp, Np), x_p.dtype),
            grid_spec=pltpu.PrefetchScalarGridSpec(
                num_scalar_prefetch=0,
                grid=(Mp // tm, Np // tn),
                in_specs=[
                    pl.BlockSpec((tm, tk), lambda i, j: (i, 0)),
                    pl.BlockSpec((tk, tn), lambda i, j: (0, j)),
                    pl.BlockSpec((1, tn), lambda i, j: (0, j)),
                ],
                out_specs=pl.BlockSpec((tm, tn), lambda i, j: (i, j)),
            ),
            compiler_params=pltpu.CompilerParams(
                dimension_semantics=("parallel", "parallel"),
                vmem_limit_bytes=cfg["vmem_limit"]),
            cost_estimate=cost,
        )(x_p, wt_p, b_p)

    return pl.pallas_call(
        _linear_kernel_multi_k,
        out_shape=jax.ShapeDtypeStruct((Mp, Np), x_p.dtype),
        grid_spec=pltpu.PrefetchScalarGridSpec(
            num_scalar_prefetch=0,
            grid=(Mp // tm, Np // tn, n_k),
            in_specs=[
                pl.BlockSpec((tm, tk), lambda i, j, k: (i, k)),
                pl.BlockSpec((tk, tn), lambda i, j, k: (k, j)),
                pl.BlockSpec((1, tn), lambda i, j, k: (0, j)),
            ],
            out_specs=pl.BlockSpec((tm, tn), lambda i, j, k: (i, j)),
            scratch_shapes=[pltpu.VMEM((tm, tn), jnp.float32)],
        ),
        compiler_params=pltpu.CompilerParams(
            dimension_semantics=("parallel", "parallel", "arbitrary"),
            vmem_limit_bytes=cfg["vmem_limit"]),
        cost_estimate=cost,
    )(x_p, wt_p, b_p)


# ----------------------------------------------------------------------------
# Kernel 2: allreduce_params hot path (simulated data-parallel group).
# One pallas_call per parameter; each replica's grad is a SEPARATE input ref
# (no wrapper-side coalescing copy).  The replica reduction is an unrolled,
# fully-packed VPU add followed by one multiply with the precomputed 1/world.
# ----------------------------------------------------------------------------
def _make_reduce_kernel(world, inv_world):
    def kernel(*refs):
        o_ref = refs[world]
        acc = refs[0][...].astype(jnp.float32)
        for r in range(1, world):
            acc = acc + refs[r][...].astype(jnp.float32)
        o_ref[...] = (acc * inv_world).astype(o_ref.dtype)
    return kernel


def _pick_rows_block(R, C, itemsize, world, cfg):
    if R <= 8 or R % 8 != 0:
        return R                                    # single full-array block
    # ~4 MiB per replica per grid step amortizes the ~0.35 us/step overhead,
    # while (world inputs + out) double-buffered must stay inside the budget.
    target = max(8, (4 * 1024 * 1024) // max(1, C * itemsize))
    budget_rows = max(8, cfg["budget"] // (2 * (world + 1) * C * itemsize))
    target = min(target, budget_rows)
    rb = 8
    for cand in (4096, 2048, 1024, 512, 256, 128, 64, 32, 16, 8):
        if cand <= target and R % cand == 0:
            rb = cand
            break
    # v7x megacore: keep >= 2 row tiles when possible so both cores get work.
    if rb == R and R >= 16 and (R // 2) % 8 == 0:
        rb = R // 2
    return rb


def _allreduce_one(grads, cfg):
    """All-reduce (mean) one parameter's gradient across replicas."""
    world = len(grads)
    g0 = grads[0]
    orig_shape = g0.shape
    if g0.ndim >= 2:
        C = int(orig_shape[-1])
        R = int(math.prod(orig_shape[:-1]))
    else:
        C = int(orig_shape[0]) if g0.ndim == 1 else 1
        R = 1
    # Collapse leading dims: layout-preserving reshape, no extra HBM pass.
    g2 = [g.reshape(R, C) for g in grads]
    itemsize = jnp.dtype(g0.dtype).itemsize

    rb = _pick_rows_block(R, C, itemsize, world, cfg)
    cost = pl.CostEstimate(
        flops=world * R * C,
        transcendentals=0,
        bytes_accessed=(world + 1) * R * C * itemsize)

    out = pl.pallas_call(
        _make_reduce_kernel(world, 1.0 / float(world)),
        out_shape=jax.ShapeDtypeStruct((R, C), g0.dtype),
        grid_spec=pltpu.PrefetchScalarGridSpec(
            num_scalar_prefetch=0,
            grid=(R // rb,),
            in_specs=[pl.BlockSpec((rb, C), lambda i: (i, 0)) for _ in range(world)],
            out_specs=pl.BlockSpec((rb, C), lambda i: (i, 0)),
        ),
        compiler_params=pltpu.CompilerParams(
            dimension_semantics=("parallel",),      # shards row tiles across TCs (v7x)
            vmem_limit_bytes=cfg["vmem_limit"]),
        cost_estimate=cost,
    )(*g2)
    return out.reshape(orig_shape)


# ----------------------------------------------------------------------------
# DDP wrapper (JAX side).
# ----------------------------------------------------------------------------
class DistributedDataParallel:
    def __init__(self, params, world_size=4):
        # TODO(synk): dist.broadcast of params from the tensor-model-parallel src
        # rank has no single-chip Pallas equivalent; all replicas start identical.
        self.params = dict(params)          # {'weight': (OUT, IN), 'bias': (OUT,)}
        self.world_size = world_size
        self.needs_reduction = False
        self.warn_on_half = False
        self._cfg = _TPU_CFG
        self._tile_cache = {}

        w = self.params["weight"]
        b = self.params["bias"]
        OUT, IN = w.shape
        self._Kp = _round_up(IN, 128)
        self._Np = _round_up(OUT, 128)
        # Cache the pre-transposed, pre-padded weight & bias ONCE (the per-call
        # w.T + pad was a full extra HBM read+write of the weight per forward).
        wt = w.T
        if (self._Kp, self._Np) != (IN, OUT):
            wt = jnp.pad(wt, ((0, self._Kp - IN), (0, self._Np - OUT)))
        self._wt_p = wt
        b2 = b.reshape(1, OUT)
        if self._Np != OUT:
            b2 = jnp.pad(b2, ((0, 0), (0, self._Np - OUT)))
        self._b_p = b2

    def forward(self, x):
        self.needs_reduction = True
        B, IN = x.shape
        OUT = self.params["weight"].shape[0]
        key = (B, str(x.dtype))
        tiles = self._tile_cache.get(key)
        if tiles is None:
            tiles = _linear_tiles(B, self._Kp, self._Np,
                                  jnp.dtype(x.dtype).itemsize, self._cfg)
            self._tile_cache[key] = tiles
        tm, Mp, tk, tn, n_k = tiles
        if (Mp, self._Kp) == (B, IN):
            x_p = x                                 # already aligned: skip the pad copy
        else:
            x_p = jnp.pad(x, ((0, Mp - B), (0, self._Kp - IN)))
        out = _linear_forward_padded(x_p, self._wt_p, self._b_p,
                                     tm, tk, tn, n_k, self._cfg)
        if (Mp, self._Np) == (B, OUT):
            return out
        return out[:B, :OUT]

    __call__ = forward

    def allreduce_params(self, per_replica_grads):
        """per_replica_grads: list (len world_size) of {'weight':..., 'bias':...}.
        Per-parameter all-reduce (sum) -> scale by 1/world (== flatten/all_reduce/
        unflatten semantics of the original hook, without the coalescing copy)."""
        # TODO(synk): real multi-chip DDP would use a ring reduce-scatter /
        # all-gather via pltpu.make_async_remote_copy + collective_id; here the
        # data-parallel group is simulated by per-replica inputs on one chip.
        if not self.needs_reduction:
            return None
        self.needs_reduction = False
        world = self.world_size
        out = {}
        for name in self.params:
            grads = [per_replica_grads[r][name] for r in range(world)]
            out[name] = _allreduce_one(grads, self._cfg)
        return out

    def state_dict(self):
        return dict(self.params)

    def load_state_dict(self, state_dict, strict=True):
        self.params = dict(state_dict)


if __name__ == "__main__":
    key = jax.random.PRNGKey(0)
    k_x, k_w, k_b, k_g = jax.random.split(key, 4)

    B, IN, OUT, WORLD = 2, 32, 32, 4

    bound = 1.0 / math.sqrt(IN)
    params = {
        "weight": jax.random.uniform(k_w, (OUT, IN), jnp.float32, -bound, bound),
        "bias":   jax.random.uniform(k_b, (OUT,),   jnp.float32, -bound, bound),
    }
    x = jax.random.normal(k_x, (B, IN), jnp.float32)

    ddp = DistributedDataParallel(params, world_size=WORLD)

    # Forward (delegates to wrapped module, via the Pallas linear kernel).
    y = ddp(x)
    y = jax.block_until_ready(y)
    y_ref = x @ params["weight"].T + params["bias"]
    assert jnp.allclose(y, y_ref, atol=1e-5), "forward mismatch"

    # Simulated per-replica gradients, then the all-reduce hook path.
    gkeys = jax.random.split(k_g, WORLD * 2)
    per_replica_grads = [
        {"weight": jax.random.normal(gkeys[2 * r], (OUT, IN), jnp.float32),
         "bias":   jax.random.normal(gkeys[2 * r + 1], (OUT,), jnp.float32)}
        for r in range(WORLD)
    ]
    synced = ddp.allreduce_params(per_replica_grads)
    synced = {k: jax.block_until_ready(v) for k, v in synced.items()}

    ref_w = sum(g["weight"] for g in per_replica_grads) / WORLD
    ref_b = sum(g["bias"] for g in per_replica_grads) / WORLD
    assert jnp.allclose(synced["weight"], ref_w, atol=1e-5), "allreduce weight mismatch"
    assert jnp.allclose(synced["bias"], ref_b, atol=1e-5), "allreduce bias mismatch"

    print("KERNEL_OK")
</pallas_src>

<mosaic_0001>
module attributes {stable_mosaic.version = 11 : i64} {
  func.func @_linear_kernel_single_k(%arg0: i32, %arg1: i32, %arg2: memref<8x128xf32, #tpu.memory_space<vmem>>, %arg3: memref<128x128xf32, #tpu.memory_space<vmem>>, %arg4: memref<1x128xf32, #tpu.memory_space<vmem>>, %arg5: memref<8x128xf32, #tpu.memory_space<vmem>>) attributes {dimension_semantics = [#tpu.dimension_semantics<parallel>, #tpu.dimension_semantics<parallel>], iteration_bounds = array<i64: 1, 1>, scalar_prefetch = 0 : i64, scratch_operands = 0 : i64, tpu.core_type = #tpu.core_type<tc>, window_params = [{transform_indices = @transform_0, window_bounds = array<i64: 8, 128>}, {transform_indices = @transform_1, window_bounds = array<i64: 128, 128>}, {transform_indices = @transform_2, window_bounds = array<i64: 1, 128>}, {transform_indices = @transform_3, window_bounds = array<i64: 8, 128>}]} {
    %c0 = arith.constant 0 : index
    %c0_0 = arith.constant 0 : index
    %0 = vector.load %arg2[%c0, %c0_0] : memref<8x128xf32, #tpu.memory_space<vmem>>, vector<8x128xf32>
    %c0_1 = arith.constant 0 : index
    %c0_2 = arith.constant 0 : index
    %1 = vector.load %arg3[%c0_1, %c0_2] : memref<128x128xf32, #tpu.memory_space<vmem>>, vector<128x128xf32>
    %cst = arith.constant dense<0.000000e+00> : vector<8x128xf32>
    %2 = tpu.matmul %0, %1, %cst {dimension_numbers = #tpu.dot_dimension_numbers<[1], [0], [0], [1], [0, 0, 1, 1], [], []>} : vector<8x128xf32>, vector<128x128xf32>, vector<8x128xf32> -> vector<8x128xf32>
    %c0_3 = arith.constant 0 : index
    %c0_4 = arith.constant 0 : index
    %3 = vector.load %arg4[%c0_3, %c0_4] : memref<1x128xf32, #tpu.memory_space<vmem>>, vector<1x128xf32>
    %4 = vector.broadcast %3 : vector<1x128xf32> to vector<8x128xf32>
    %5 = arith.addf %2, %4 : vector<8x128xf32>
    %c0_5 = arith.constant 0 : index
    %c0_6 = arith.constant 0 : index
    %6 = vector.load %arg5[%c0_5, %c0_6] : memref<8x128xf32, #tpu.memory_space<vmem>>, vector<8x128xf32>
    tpu.vector_store %arg5[%c0_5, %c0_6], %5 {strides = array<i32>} : memref<8x128xf32, #tpu.memory_space<vmem>>, vector<8x128xf32>,
    return
  }
  func.func @transform_0(%arg0: i32, %arg1: i32) -> (i32, i32) {
    %c0_i32 = arith.constant 0 : i32
    %c0_i32_0 = arith.constant 0 : i32
    return %arg0, %c0_i32 : i32, i32
  }
  func.func @transform_1(%arg0: i32, %arg1: i32) -> (i32, i32) {
    %c0_i32 = arith.constant 0 : i32
    %c0_i32_0 = arith.constant 0 : i32
    return %c0_i32, %arg1 : i32, i32
  }
  func.func @transform_2(%arg0: i32, %arg1: i32) -> (i32, i32) {
    %c0_i32 = arith.constant 0 : i32
    %c0_i32_0 = arith.constant 0 : i32
    return %c0_i32, %arg1 : i32, i32
  }
  func.func @transform_3(%arg0: i32, %arg1: i32) -> (i32, i32) {
    %c0_i32 = arith.constant 0 : i32
    return %arg0, %arg1 : i32, i32
  }
}

</mosaic_0001>

<bundles_post_ra>
// kernel: tpu_custom_call.1
= control target key start
LH: loop header
LB: loop body
LE: loop exit
PB: predicated region body
PF: predicated region fallthrough
CT: control target
= control target key end

     0   :  { %8 = vsyncpa [#allocation3], 0  ;;  %s317_s0 = inlined_call_operand.hbm [shape: f32[8,128], index: 0, kind: input, shape index: {}]   ;;  %s318_s1 = inlined_call_operand.hbm [shape: f32[128,128], index: 1, kind: input, shape index: {}]   ;;  %s319_s2 = inlined_call_operand.vmem [shape: f32[1,128], index: 2, kind: input, shape index: {}]   ;;  %s320_s3 = inlined_call_operand.hbm [shape: f32[8,128], index: 3, kind: output, shape index: {}]  }
   0x1   :  { %9 = vsyncpa [#allocation6], 0 }
   0x2   :  { %10 = vsyncpa [#allocation4], 0  ;;  %s278_s12 = smov [#allocation2]   ;;  %s279_s14 = smov [#allocation5]  }
   0x3   :  { %s17_s13 = sshll.u32 %s278_s12, 4  ;;  %s26_s15 = sshll.u32 %s279_s14, 4  ;;  %s18_s13 = int_to_ptr.vmem [resolvable:$true] %s17_s13  ;;  %s27_s15 = int_to_ptr.vmem [resolvable:$true] %s26_s15 }
   0x4   :  { %s220_s16 = scalar_lea.vmem %s18_s13, 128  ;;  %p225_p1 = scmp.lt.s32.totalorder %s18_s13, %s18_s13 }
   0x5   :  { %p221_p0 = scmp.ne.s32.totalorder %s18_s13, %s220_s16  ;;  %p226_p2 = scmp.lt.s32.totalorder %s220_s16, %s220_s16 }
   0x7   :  { %p227_p3 = por %p226_p2, %p225_p1 }
   0x9   :  { %p228_p4 = pnand %p227_p3, %p221_p0 }
   0xb   :  { %231 = shalt.err (!%p228_p4)
}
   0xc   :  { %20 = dma.hbm_to_vmem [thread:$0]  %s317_s0, 128, %s18_s13, [#allocation3]  }
   0xd   :  { %s240_s19 = scalar_lea.vmem %s27_s15, 2048  ;;  %p245_p6 = scmp.lt.s32.totalorder %s27_s15, %s27_s15 }
   0xe   :  { %p241_p5 = scmp.ne.s32.totalorder %s27_s15, %s240_s19  ;;  %p246_p7 = scmp.lt.s32.totalorder %s240_s19, %s240_s19 }
  0x10   :  { %p247_p8 = por %p246_p7, %p245_p6 }
  0x12   :  { %p248_p9 = pnand %p247_p8, %p241_p5 }
  0x14   :  { %251 = shalt.err (!%p248_p9)
}
  0x15   :  { %s280_s20 = smov 128   ;;  %s281_s21 = smov 8  }
  0x16   :  { %32 = dma.hbm_to_vmem [thread:$0]  %s318_s1, 2048, %s27_s15, [#allocation6], %s280_s20, %s280_s20, %s281_s21  }
  0x17   :  { %272 = dma.done.wait [#allocation3], 128  }
  0x18   :  { %273 = vsyncadd [#allocation3], 4294967168 }
  0x19   :  { %274 = dma.done.wait [#allocation6], 2048  }
  0x1a   :  { %275 = vsyncadd [#allocation6], 4294965248  ;;  %v282_v0 = vmov 0.0   ;;  %vm283_vm0 = vmmov 0   ;;  %v57_v1 = vld [vmem:[#allocation5 + $0x78] sm:$0xff]  ;;  %v56_v2 = vld [vmem:[#allocation5 + $0x70] sm:$0xff] }
  0x1b   :  { %170 = vmatprep.subr.mxu0 %v282_v0  ;;  %202 = vmatprep.mubr.msk.f32.mxu0 %vm283_vm0, %v282_v0  ;;  %v55_v3 = vld [vmem:[#allocation5 + $0x68] sm:$0xff]  ;;  %v54_v4 = vld [vmem:[#allocation5 + $0x60] sm:$0xff]  ;;  %v53_v5 = vld [vmem:[#allocation5 + $0x58] sm:$0xff]  ;;  %s284_s24 = smov [#allocation7]  }
  0x1c   :  { %171 = vmatpush3.msra.mxu0 %v57_v1  ;;  %v52_v6 = vld [vmem:[#allocation5 + $0x50] sm:$0xff]  ;;  %v51_v7 = vld [vmem:[#allocation5 + $0x48] sm:$0xff]  ;;  %v50_v8 = vld [vmem:[#allocation5 + $0x40] sm:$0xff]  ;;  %s142_s25 = sshll.u32 %s284_s24, 4  ;;  %s143_s25 = int_to_ptr.vmem [resolvable:$true] %s142_s25 }
  0x1d   :  { %172 = vmatprep.subr.mxu0 %v282_v0  ;;  %v49_v9 = vld [vmem:[#allocation5 + $0x38] sm:$0xff]  ;;  %v48_v10 = vld [vmem:[#allocation5 + $0x30] sm:$0xff]  ;;  %v47_v11 = vld [vmem:[#allocation5 + $0x28] sm:$0xff]  ;;  %s252_s26 = scalar_lea.vmem %s143_s25, 128  ;;  %p257_p11 = scmp.lt.s32.totalorder %s143_s25, %s143_s25 }
  0x1e   :  { %173 = vmatpush3.msra.mxu0 %v56_v2  ;;  %v46_v12 = vld [vmem:[#allocation5 + $0x20] sm:$0xff]  ;;  %v45_v13 = vld [vmem:[#allocation5 + $0x18] sm:$0xff]  ;;  %v44_v14 = vld [vmem:[#allocation5 + $0x10] sm:$0xff]  ;;  %p253_p10 = scmp.ne.s32.totalorder %s143_s25, %s252_s26  ;;  %p258_p12 = scmp.lt.s32.totalorder %s252_s26, %s252_s26 }
  0x1f   :  { %174 = vmatprep.subr.mxu0 %v282_v0  ;;  %v43_v15 = vld [vmem:[#allocation5 + $0x8] sm:$0xff]  ;;  %v42_v16 = vld [vmem:[#allocation5] sm:$0xff]  ;;  %v41_v17 = vld [vmem:[#allocation2] sm:$0xff] }
  0x20   :  { %175 = vmatpush3.msra.mxu0 %v55_v3  ;;  %v152_v18 = vld [vmem:[%s319_s2] ss:$0 sm:$0xff]  ;;  %p259_p13 = por %p258_p12, %p257_p11 }
  0x21   :  { %176 = vmatprep.subr.mxu0 %v282_v0 }
  0x22   :  { %177 = vmatpush3.msra.mxu0 %v54_v4  ;;  %p260_p0 = pnand %p259_p13, %p253_p10 }
  0x23   :  { %178 = vmatprep.subr.mxu0 %v282_v0 }
  0x24   :  { %179 = vmatpush3.msra.mxu0 %v53_v5 }
  0x25   :  { %180 = vmatprep.subr.mxu0 %v282_v0 }
  0x26   :  { %181 = vmatpush3.msra.mxu0 %v52_v6 }
  0x27   :  { %182 = vmatprep.subr.mxu0 %v282_v0 }
  0x28   :  { %183 = vmatpush3.msra.mxu0 %v51_v7 }
  0x29   :  { %184 = vmatprep.subr.mxu0 %v282_v0 }
  0x2a   :  { %185 = vmatpush3.msra.mxu0 %v50_v8 }
  0x2b   :  { %186 = vmatprep.subr.mxu0 %v282_v0 }
  0x2c   :  { %187 = vmatpush3.msra.mxu0 %v49_v9 }
  0x2d   :  { %188 = vmatprep.subr.mxu0 %v282_v0 }
  0x2e   :  { %189 = vmatpush3.msra.mxu0 %v48_v10 }
  0x2f   :  { %190 = vmatprep.subr.mxu0 %v282_v0 }
  0x30   :  { %191 = vmatpush3.msra.mxu0 %v47_v11 }
  0x31   :  { %192 = vmatprep.subr.mxu0 %v282_v0 }
  0x32   :  { %193 = vmatpush3.msra.mxu0 %v46_v12 }
  0x33   :  { %194 = vmatprep.subr.mxu0 %v282_v0 }
  0x34   :  { %195 = vmatpush3.msra.mxu0 %v45_v13 }
  0x35   :  { %196 = vmatprep.subr.mxu0 %v282_v0 }
  0x36   :  { %197 = vmatpush3.msra.mxu0 %v44_v14 }
  0x37   :  { %198 = vmatprep.subr.mxu0 %v282_v0 }
  0x38   :  { %199 = vmatpush3.msra.mxu0 %v43_v15 }
  0x39   :  { %200 = vmatprep.subr.mxu0 %v282_v0 }
  0x3a   :  { %201 = vmatpush3.msra.mxu0 %v42_v16 }
  0x3b   :  { %203 = vmatmul.mubr.f32.vlgmr.msra.gmra.mxu0 %v41_v17 }
  0xfb   :  { %v131_v19 = vpop.f32.mrf.mxu0 }
  0xfc   :  { %v132_v20 = vadd.f32 %v152_v18, %v131_v19 }
  0xfd   :  { %v204_v21 = vpop.f32.mrf.mxu0 }
  0xfe   :  { %135 = vst [vmem:[#allocation7] sm:$0xff] %v132_v20 }
  0xff   :  { %263 = shalt.err (!%p260_p0)
}
 0x100   :  { %145 = dma.vmem_to_hbm [thread:$0]  %s143_s25, 128, %s320_s3, [#allocation4]  }
 0x101   :  { %276 = dma.done.wait [#allocation4], 128  }
 0x102   :  { %277 = vsyncadd [#allocation4], 4294967168 }
 0x103   :  { %149 = vsyncpa [#allocation3], 1 }
 0x104   :  { %150 = vsyncpa [#allocation6], 1 }
 0x105   :  { %151 = vsyncpa [#allocation4], 1 }

</bundles_post_ra>
